<compile_context>
chip_gen: v7x
topology: tpu7x:2x2x1
jax: 0.10.0
libtpu: 0.0.40
codegen_flags: <defaults>
</compile_context>

<pallas_src>
import functools

import jax
import jax.numpy as jnp
from jax.experimental import pallas as pl
from jax.experimental.pallas import tpu as pltpu

# MLP dims (from nn.Sequential in __init__)
D_IN, H1, H2, H3, D_OUT = 7, 64, 32, 7, 1
# Augmented (bias-folded) dims: input K 7->8 (bias lane); hidden outputs carry a
# pass-through 1.0 row (64->65, 32->33, 7->8 -- the last pads to 8 sublanes anyway).
D_INA, H1A, H2A, H3A = D_IN + 1, H1 + 1, H2 + 1, H3 + 1   # 8, 65, 33, 8


def _round_up(n, m):
    return ((n + m - 1) // m) * m


def mlp_kernel(x_ref, w1_ref, w2_ref, w3_ref, w4_ref, o_ref, *, act_dtype):
    # x: (8, bm) f32 -- rows 0..6 = features, row 7 = 1.0 (bias lane).
    # Biases are folded into the augmented weights, so each layer is just an
    # MXU matmul followed by a ReLU on the VPU.
    x = x_ref[...]
    h = jnp.dot(w1_ref[...], x, preferred_element_type=jnp.float32)    # (65, bm)
    h = jnp.maximum(h.astype(act_dtype), 0.0)                          # row 64 == 1.0
    h = jnp.dot(w2_ref[...], h, preferred_element_type=jnp.float32)    # (33, bm)
    h = jnp.maximum(h.astype(act_dtype), 0.0)                          # row 32 == 1.0
    h = jnp.dot(w3_ref[...], h, preferred_element_type=jnp.float32)    # (8, bm)
    h = jnp.maximum(h.astype(act_dtype), 0.0)                          # row 7  == 1.0
    y = jnp.dot(w4_ref[...], h, preferred_element_type=jnp.float32)    # (1, bm)
    o_ref[...] = jnp.maximum(y, 0.0).astype(o_ref.dtype)


def _augment_params(params, act_dtype):
    """Fold biases into the weights (K-augmentation) and add pass-through rows
    that carry the constant-1.0 bias lane from layer to layer."""
    (w1, b1), (w2, b2), (w3, b3), (w4, b4) = params
    f32 = jnp.float32

    def fold(w, b, k_aug, passthrough):
        wa = jnp.concatenate([w.astype(f32), b.astype(f32)[:, None]], axis=1)
        if passthrough:
            ones_row = jnp.zeros((1, k_aug), f32).at[0, k_aug - 1].set(1.0)
            wa = jnp.concatenate([wa, ones_row], axis=0)
        return wa

    w1a = fold(w1, b1, D_INA, True)     # (65, 8)  -- stays f32 (x is f32)
    w2a = fold(w2, b2, H1A, True)       # (33, 65)
    w3a = fold(w3, b3, H2A, True)       # (8, 33)
    w4a = fold(w4, b4, H3A, False)      # (1, 8)
    return w1a, w2a.astype(act_dtype), w3a.astype(act_dtype), w4a.astype(act_dtype)


def _forward_fm(x_fm, aug_w, *, bm, act_dtype):
    """Core pallas_call. x_fm: (8, N) f32 feature-major, row 7 == 1.0.
    Returns (1, N) f32."""
    w1a, w2a, w3a, w4a = aug_w
    n = x_fm.shape[1]

    # Batch tile: multiple of 128 lanes; ensure >=2 grid steps whenever N > 128
    # so the "parallel" grid axis can shard across both v7x TensorCores.
    bm = _round_up(max(bm, 128), 128)
    if n > 128:
        bm_eff = min(bm, _round_up(-(-n // 2), 128))
    else:
        bm_eff = 128
    n_pad = _round_up(n, bm_eff)
    if n_pad != n:
        # Padded columns have bias lane == 0 -> every layer outputs 0 for them.
        x_fm = jnp.pad(x_fm, ((0, 0), (0, n_pad - n)))

    grid = (n_pad // bm_eff,)
    const = lambda i: (0, 0)   # weights: block index never changes -> DMA'd once

    # Scheduler hint on *padded* traffic.
    n_wts = H1A * D_INA + H2A * H1A + H3A * H2A + D_OUT * H3A
    flops = 2 * n_pad * n_wts
    bytes_accessed = 4 * n_pad * (D_INA + D_OUT) + 4 * n_wts
    cost = pl.CostEstimate(flops=flops, transcendentals=0,
                           bytes_accessed=bytes_accessed)

    # Explicit VMEM budget: double-buffered x/out tiles + live (sublane-padded)
    # intermediates, 2x headroom, capped below v7x's 64 MiB/TC physical VMEM.
    act_bytes = jnp.dtype(act_dtype).itemsize
    per_lane = (2 * D_INA * 4 + 2 * D_OUT * 4
                + (_round_up(H1A, 8) + _round_up(H2A, 8) + _round_up(H3A, 8)) * act_bytes
                + 8 * 4)
    vmem_limit = int(min(max(2 * per_lane * bm_eff, 32 * 1024 * 1024),
                         60 * 1024 * 1024))

    kernel = functools.partial(mlp_kernel, act_dtype=act_dtype)
    out_fm = pl.pallas_call(
        kernel,
        out_shape=jax.ShapeDtypeStruct((D_OUT, n_pad), jnp.float32),
        grid_spec=pltpu.PrefetchScalarGridSpec(
            num_scalar_prefetch=0,
            grid=grid,
            in_specs=[
                pl.BlockSpec((D_INA, bm_eff), lambda i: (0, i)),   # x tile (batch on lanes)
                pl.BlockSpec((H1A, D_INA), const),
                pl.BlockSpec((H2A, H1A), const),
                pl.BlockSpec((H3A, H2A), const),
                pl.BlockSpec((D_OUT, H3A), const),
            ],
            out_specs=pl.BlockSpec((D_OUT, bm_eff), lambda i: (0, i)),
        ),
        compiler_params=pltpu.CompilerParams(
            dimension_semantics=("parallel",),
            vmem_limit_bytes=vmem_limit),
        cost_estimate=cost,
    )(x_fm, w1a, w2a, w3a, w4a)
    return out_fm[:, :n]


def reg_ffr_forward(x, params, *, bm=32768, act_dtype=jnp.float32):
    """RegFFR forward. x: (N, 7) f32 (PyTorch batch-major layout). Returns (N, 1).

    act_dtype=jnp.bfloat16 runs hidden activations / ReLUs in bf16 (recommended
    on v6e/v7x which have bf16 VALUs; keep the f32 default on v5e).  Call under
    jax.jit so the layout plumbing below fuses into a single pass; for large N
    prefer reg_ffr_forward_feature_major and keep x in (8, N) layout."""
    N = x.shape[0]
    assert x.shape[1] == D_IN
    aug_w = _augment_params(params, act_dtype)
    # Append the constant-1.0 bias lane and go feature-major (batch -> lanes).
    x_fm = jnp.transpose(
        jnp.concatenate([x.astype(jnp.float32), jnp.ones((N, 1), jnp.float32)],
                        axis=1))                                       # (8, N)
    out_fm = _forward_fm(x_fm, aug_w, bm=bm, act_dtype=act_dtype)      # (1, N)
    return jnp.transpose(out_fm)                                       # (N, 1): free reshape


def reg_ffr_forward_feature_major(x_fm, params, *, bm=32768, act_dtype=jnp.float32):
    """Layout-contract variant: x_fm is (8, N) f32 feature-major with row 7
    already set to 1.0 (bias lane).  Skips the wrapper transpose/concat HBM
    pass entirely.  Returns (1, N) f32."""
    assert x_fm.shape[0] == D_INA
    aug_w = _augment_params(params, act_dtype)
    return _forward_fm(x_fm, aug_w, bm=bm, act_dtype=act_dtype)


def init_params(key):
    """PyTorch nn.Linear-style init (uniform +-1/sqrt(fan_in)); weights (out, in)."""
    dims = [(H1, D_IN), (H2, H1), (H3, H2), (D_OUT, H3)]
    params = []
    for out_d, in_d in dims:
        key, kw, kb = jax.random.split(key, 3)
        bound = 1.0 / (in_d ** 0.5)
        w = jax.random.uniform(kw, (out_d, in_d), jnp.float32, -bound, bound)
        b = jax.random.uniform(kb, (out_d,), jnp.float32, -bound, bound)
        params.append((w, b))
    return params


def reference_forward(x, params):
    h = x
    for w, b in params:
        h = jnp.maximum(h @ w.T + b, 0.0)
    return h


if __name__ == "__main__":
    key = jax.random.PRNGKey(0)
    kp, kx = jax.random.split(key)
    params = init_params(kp)

    N = 200   # small batch; exercises the 2-step grid and the padded tail
    x = jax.random.normal(kx, (N, D_IN), jnp.float32)

    out = jax.block_until_ready(jax.jit(reg_ffr_forward)(x, params))

    ref = reference_forward(x, params)
    assert out.shape == (N, D_OUT)
    # The MXU executes f32 matmuls via bf16 passes; with biases folded into the
    # matmul the bias term can pick up ~1e-3-level rounding vs the unfused
    # reference, hence the tolerance.
    assert jnp.allclose(out, ref, atol=1e-3, rtol=1e-3), \
        float(jnp.max(jnp.abs(out - ref)))

    # Also exercise the transpose-free feature-major entry point.
    x_fm = jnp.concatenate([x.T, jnp.ones((1, N), jnp.float32)], axis=0)
    out_fm = jax.block_until_ready(
        jax.jit(reg_ffr_forward_feature_major)(x_fm, params))
    assert out_fm.shape == (D_OUT, N)
    assert jnp.allclose(out_fm.T, ref, atol=1e-3, rtol=1e-3)

    print("KERNEL_OK")
</pallas_src>

<mosaic_0001>
module attributes {stable_mosaic.version = 11 : i64} {
  func.func @mlp_kernel(%arg0: i32, %arg1: memref<8x128xf32, #tpu.memory_space<vmem>>, %arg2: memref<65x8xf32, #tpu.memory_space<vmem>>, %arg3: memref<33x65xf32, #tpu.memory_space<vmem>>, %arg4: memref<8x33xf32, #tpu.memory_space<vmem>>, %arg5: memref<1x8xf32, #tpu.memory_space<vmem>>, %arg6: memref<1x128xf32, #tpu.memory_space<vmem>>) attributes {dimension_semantics = [#tpu.dimension_semantics<parallel>], iteration_bounds = array<i64: 2>, scalar_prefetch = 0 : i64, scratch_operands = 0 : i64, tpu.core_type = #tpu.core_type<tc>, window_params = [{transform_indices = @transform_0, window_bounds = array<i64: 8, 128>}, {pipeline_mode = #tpu.pipeline_mode<synchronous>, transform_indices = @transform_1, window_bounds = array<i64: 65, 8>}, {pipeline_mode = #tpu.pipeline_mode<synchronous>, transform_indices = @transform_2, window_bounds = array<i64: 33, 65>}, {pipeline_mode = #tpu.pipeline_mode<synchronous>, transform_indices = @transform_3, window_bounds = array<i64: 8, 33>}, {pipeline_mode = #tpu.pipeline_mode<synchronous>, transform_indices = @transform_4, window_bounds = array<i64: 1, 8>}, {transform_indices = @transform_5, window_bounds = array<i64: 1, 128>}]} {
    %c0 = arith.constant 0 : index
    %c0_0 = arith.constant 0 : index
    %0 = vector.load %arg1[%c0, %c0_0] : memref<8x128xf32, #tpu.memory_space<vmem>>, vector<8x128xf32>
    %c0_1 = arith.constant 0 : index
    %c0_2 = arith.constant 0 : index
    %1 = vector.load %arg2[%c0_1, %c0_2] : memref<65x8xf32, #tpu.memory_space<vmem>>, vector<65x8xf32>
    %cst = arith.constant dense<0.000000e+00> : vector<65x128xf32>
    %2 = tpu.matmul %1, %0, %cst {dimension_numbers = #tpu.dot_dimension_numbers<[1], [0], [0], [1], [0, 0, 1, 1], [], []>} : vector<65x8xf32>, vector<8x128xf32>, vector<65x128xf32> -> vector<65x128xf32>
    %cst_3 = arith.constant 0.000000e+00 : f32
    %3 = vector.broadcast %cst_3 : f32 to vector<65x128xf32>
    %4 = arith.maximumf %2, %3 : vector<65x128xf32>
    %c0_4 = arith.constant 0 : index
    %c0_5 = arith.constant 0 : index
    %5 = vector.load %arg3[%c0_4, %c0_5] : memref<33x65xf32, #tpu.memory_space<vmem>>, vector<33x65xf32>
    %cst_6 = arith.constant dense<0.000000e+00> : vector<33x128xf32>
    %6 = tpu.matmul %5, %4, %cst_6 {dimension_numbers = #tpu.dot_dimension_numbers<[1], [0], [0], [1], [0, 0, 1, 1], [], []>} : vector<33x65xf32>, vector<65x128xf32>, vector<33x128xf32> -> vector<33x128xf32>
    %cst_7 = arith.constant 0.000000e+00 : f32
    %7 = vector.broadcast %cst_7 : f32 to vector<33x128xf32>
    %8 = arith.maximumf %6, %7 : vector<33x128xf32>
    %c0_8 = arith.constant 0 : index
    %c0_9 = arith.constant 0 : index
    %9 = vector.load %arg4[%c0_8, %c0_9] : memref<8x33xf32, #tpu.memory_space<vmem>>, vector<8x33xf32>
    %cst_10 = arith.constant dense<0.000000e+00> : vector<8x128xf32>
    %10 = tpu.matmul %9, %8, %cst_10 {dimension_numbers = #tpu.dot_dimension_numbers<[1], [0], [0], [1], [0, 0, 1, 1], [], []>} : vector<8x33xf32>, vector<33x128xf32>, vector<8x128xf32> -> vector<8x128xf32>
    %cst_11 = arith.constant 0.000000e+00 : f32
    %11 = vector.broadcast %cst_11 : f32 to vector<8x128xf32>
    %12 = arith.maximumf %10, %11 : vector<8x128xf32>
    %c0_12 = arith.constant 0 : index
    %c0_13 = arith.constant 0 : index
    %13 = vector.load %arg5[%c0_12, %c0_13] : memref<1x8xf32, #tpu.memory_space<vmem>>, vector<1x8xf32>
    %cst_14 = arith.constant dense<0.000000e+00> : vector<1x128xf32>
    %14 = tpu.matmul %13, %12, %cst_14 {dimension_numbers = #tpu.dot_dimension_numbers<[1], [0], [0], [1], [0, 0, 1, 1], [], []>} : vector<1x8xf32>, vector<8x128xf32>, vector<1x128xf32> -> vector<1x128xf32>
    %cst_15 = arith.constant 0.000000e+00 : f32
    %15 = vector.broadcast %cst_15 : f32 to vector<1x128xf32>
    %16 = arith.maximumf %14, %15 : vector<1x128xf32>
    %c0_16 = arith.constant 0 : index
    %c0_17 = arith.constant 0 : index
    %17 = vector.load %arg6[%c0_16, %c0_17] : memref<1x128xf32, #tpu.memory_space<vmem>>, vector<1x128xf32>
    tpu.vector_store %arg6[%c0_16, %c0_17], %16 {strides = array<i32>} : memref<1x128xf32, #tpu.memory_space<vmem>>, vector<1x128xf32>,
    return
  }
  func.func @transform_0(%arg0: i32) -> (i32, i32) {
    %c0_i32 = arith.constant 0 : i32
    %c0_i32_0 = arith.constant 0 : i32
    return %c0_i32, %arg0 : i32, i32
  }
  func.func @transform_1(%arg0: i32) -> (i32, i32) {
    %c0_i32 = arith.constant 0 : i32
    %c0_i32_0 = arith.constant 0 : i32
    %c0_i32_1 = arith.constant 0 : i32
    return %c0_i32, %c0_i32_0 : i32, i32
  }
  func.func @transform_2(%arg0: i32) -> (i32, i32) {
    %c0_i32 = arith.constant 0 : i32
    %c0_i32_0 = arith.constant 0 : i32
    %c0_i32_1 = arith.constant 0 : i32
    return %c0_i32, %c0_i32_0 : i32, i32
  }
  func.func @transform_3(%arg0: i32) -> (i32, i32) {
    %c0_i32 = arith.constant 0 : i32
    %c0_i32_0 = arith.constant 0 : i32
    %c0_i32_1 = arith.constant 0 : i32
    return %c0_i32, %c0_i32_0 : i32, i32
  }
  func.func @transform_4(%arg0: i32) -> (i32, i32) {
    %c0_i32 = arith.constant 0 : i32
    %c0_i32_0 = arith.constant 0 : i32
    %c0_i32_1 = arith.constant 0 : i32
    return %c0_i32, %c0_i32_0 : i32, i32
  }
  func.func @transform_5(%arg0: i32) -> (i32, i32) {
    %c0_i32 = arith.constant 0 : i32
    %c0_i32_0 = arith.constant 0 : i32
    return %c0_i32, %arg0 : i32, i32
  }
}

</mosaic_0001>

<bundles_post_ra>
// kernel: reg_ffr_forward.1
= control target key start
LH: loop header
LB: loop body
LE: loop exit
PB: predicated region body
PF: predicated region fallthrough
CT: control target
= control target key end

     0   :  { %s905_s18 = smov 0   ;;  %s1028_s0 = inlined_call_operand.vmem [shape: f32[8,256], index: 0, kind: input, shape index: {}]   ;;  %s1029_s1 = inlined_call_operand.vmem [shape: f32[65,8], index: 1, kind: input, shape index: {}]   ;;  %s1030_s2 = inlined_call_operand.vmem [shape: f32[33,65], index: 2, kind: input, shape index: {}]   ;;  %s1031_s3 = inlined_call_operand.vmem [shape: f32[8,33], index: 3, kind: input, shape index: {}]   ;;  %s1032_s4 = inlined_call_operand.vmem [shape: f32[1,8], index: 4, kind: input, shape index: {}]   ;;  %s1033_s5 = inlined_call_operand.vmem [shape: f32[1,256], index: 5, kind: output, shape index: {}]  }
   0x1 LB: > { %s697_s19 = sadd.s32 4294967295, %s870_s18   ;;  %p701_p0 = scmp.ge.s32.totalorder %s870_s18, 1  ;;  %s870_s18 = sphi %s905_s18, %s15_s18  }
   0x2   : > { %p186_p1 = scmp.lt.s32.totalorder %s870_s18, 3 }
   0x4   : > { %p187_p2 = pnand %p701_p0, %p186_p1 }
   0x5   : > { %p211_p3 = scmp.lt.s32.totalorder (!%p187_p2), %s697_s19, 1  ;;  %v872_v0 = vmov (!%p187_p2), 0.0   ;;  %vm873_vm0 = vmmov (!%p187_p2), 0   ;;  %v219_v1 = vld [vmem:[%s1029_s1] sm:$0xff] (!%p187_p2)  ;;  %vm228_vm1 = vcmask (!%p187_p2), 64512   ;;  %v220_v3 = vld [vmem:[%s1029_s1 + $0x8] sm:$0xff] (!%p187_p2) }
   0x6   : > { %190 = sbr.rel (%p187_p2) target bundleno = 930 (0x3a2), region = 40  ;;  %755 = vmatprep.subr.mxu0 (!%p187_p2), %v872_v0  ;;  %757 = vmatprep.mubr.msk.f32.mxu0 (!%p187_p2), %vm873_vm0, %v872_v0  ;;  %v221_v4 = vld [vmem:[%s1029_s1 + $0x10] sm:$0xff] (!%p187_p2)  ;;  %v222_v5 = vld [vmem:[%s1029_s1 + $0x18] sm:$0xff] (!%p187_p2)  ;;  %v223_v6 = vld [vmem:[%s1029_s1 + $0x20] sm:$0xff] (!%p187_p2)  ;;  %v874_v11 = vmov (!%p187_p2), 0.0|0.0   ;;  %vm396_vm2 = vcmask (!%p187_p2), 1040384  }
   0x7   : > { %802 = vmatprep.mubr.msk.f32.mxu1 (!%p187_p2), %vm873_vm0, %v872_v0  ;;  %v224_v7 = vld [vmem:[%s1029_s1 + $0x28] sm:$0xff] (!%p187_p2)  ;;  %v225_v8 = vld [vmem:[%s1029_s1 + $0x30] sm:$0xff] (!%p187_p2)  ;;  %v226_v9 = vld [vmem:[%s1029_s1 + $0x38] sm:$0xff] (!%p187_p2)  ;;  %835 = vmatprep.subr.bf16.mxu1 (!%p187_p2), %v874_v11  ;;  %vm380_vm3 = vcmask (!%p187_p2), 531456   ;;  %vm496_vm4 = vcmask (!%p187_p2), 269312  }
   0x8   : > { %v227_v10 = vld [vmem:[%s1029_s1 + $0x40] sm:$0x1] (!%p187_p2)  ;;  %v376_v44 = vld [vmem:[%s1030_s2 + $0x8] sm:$0xff] (!%p187_p2)  ;;  %v377_v45 = vld [vmem:[%s1030_s2 + $0x10] sm:$0xff] (!%p187_p2) }
   0x9   : > { %v375_v43 = vld [vmem:[%s1030_s2] sm:$0xff] (!%p187_p2)  ;;  %v378_v46 = vld [vmem:[%s1030_s2 + $0x18] sm:$0xff] (!%p187_p2) }
   0xa   : > { %v379_v47 = vld [vmem:[%s1030_s2 + $0x20] sm:$0x1] (!%p187_p2) }
   0xd   : > { %s1035_s19 = smov (!%p211_p3, %s697_s19), 1 }
   0xe   : > { %s702_s20 = sshll.u32 %s1035_s19, 3  ;;  %s217_s10 = scalar_lea.vmem %s1033_s5, %s1035_s19 }
   0xf   : > { %s214_s23 = scalar_lea.vmem %s1028_s0, %s702_s20 }
  0x10   : > { %v218_v2 = vld [vmem:[%s214_s23] sm:$0xff] }
  0x11   : > { %756 = vmatpush3.msra.mxu0 %v218_v2  ;;  %v495_v2 = vld [vmem:[%s1031_s3] sm:$0xff] }
  0x12   : > { %758 = vmatmul.mubr.msk.f32.vlgmr.msra.gmra.mrb[0].mxu0 %vm228_vm1, %v219_v1  ;;  %847 = vmatprep.subr.bf16.mxu0 %v874_v11 }
  0x13   : > { %760 = vmatprep.mubr.msk.f32.mxu0 %vm873_vm0, %v872_v0 }
  0x16   : > { %761 = vmatmul.mubr.msk.f32.gmra.mrb[2].mxu0 %vm228_vm1, %v220_v3 }
  0x17   : > { %763 = vmatprep.mubr.msk.f32.mxu0 %vm873_vm0, %v872_v0 }
  0x1a   : > { %764 = vmatmul.mubr.msk.f32.gmra.mrb[4].mxu0 %vm228_vm1, %v221_v4 }
  0x1b   : > { %766 = vmatprep.mubr.msk.f32.mxu0 %vm873_vm0, %v872_v0 }
  0x1e   : > { %767 = vmatmul.mubr.msk.f32.gmra.mrb[6].mxu0 %vm228_vm1, %v222_v5 }
  0x1f   : > { %769 = vmatprep.mubr.msk.f32.mxu0 %vm873_vm0, %v872_v0 }
  0x22   : > { %770 = vmatmul.mubr.msk.f32.gmra.mrb[8].mxu0 %vm228_vm1, %v223_v6  ;;  %v574_v6 = vld [vmem:[%s1032_s4] sm:$0x1] }
  0x23   : > { %772 = vmatprep.mubr.msk.f32.mxu0 %vm873_vm0, %v872_v0 }
  0x26   : > { %773 = vmatmul.mubr.msk.f32.gmra.mrb[10].mxu0 %vm228_vm1, %v224_v7 }
  0x27   : > { %775 = vmatprep.mubr.msk.f32.mxu0 %vm873_vm0, %v872_v0 }
  0x2a   : > { %776 = vmatmul.mubr.msk.f32.gmra.mrb[12].mxu0 %vm228_vm1, %v225_v8 }
  0x2b   : > { %778 = vmatprep.mubr.msk.f32.mxu0 %vm873_vm0, %v872_v0 }
  0x2e   : > { %779 = vmatmul.mubr.msk.f32.gmra.mrb[14].mxu0 %vm228_vm1, %v226_v9 }
  0x2f   : > { %781 = vmatprep.mubr.msk.f32.mxu0 %vm873_vm0, %v872_v0 }
  0x32   : > { %782 = vmatmul.mubr.msk.f32.gmra.mrb[16].mxu0 %vm228_vm1, %v227_v10 }
  0x33   : > { %827 = vmatprep.mubr.msk.f32.mxu0 %vm873_vm0, %v872_v0 }
  0xe5   : > { %v322_v12 = vpop.f32.mrb[0].mxu0 }
  0xe6   : > { %v759_v13 = vpop.f32.mrb[1].mxu0  ;;  %v366_v15 = vmax.f32 %v322_v12, 0.0 }
  0xe9   : > { %v327_v14 = vpop.f32.mrb[2].mxu0 }
  0xea   : > { %v367_v16 = vmax.f32 %v327_v14, 0.0  ;;  %v762_v17 = vpop.f32.mrb[3].mxu0 }
  0xec   : > { %v836_v18 = vpack.c.bf16 %v367_v16, %v366_v15 }
  0xed   : > { %v332_v19 = vpop.f32.mrb[4].mxu0 }
  0xee   : > { %v765_v20 = vpop.f32.mrb[5].mxu0  ;;  %837 = vmatpush3.bf16.msra.mxu1 %v836_v18  ;;  %v368_v22 = vmax.f32 %v332_v19, 0.0 }
  0xef   : > { %838 = vmatprep.subr.bf16.mxu1 %v874_v11 }
  0xf1   : > { %v337_v21 = vpop.f32.mrb[6].mxu0 }
  0xf2   : > { %v369_v23 = vmax.f32 %v337_v21, 0.0  ;;  %v768_v24 = vpop.f32.mrb[7].mxu0 }
  0xf4   : > { %v839_v25 = vpack.c.bf16 %v369_v23, %v368_v22 }
  0xf5   : > { %v342_v26 = vpop.f32.mrb[8].mxu0 }
  0xf6   : > { %v771_v27 = vpop.f32.mrb[9].mxu0  ;;  %840 = vmatpush3.bf16.msra.mxu1 %v839_v25  ;;  %v370_v29 = vmax.f32 %v342_v26, 0.0 }
  0xf7   : > { %841 = vmatprep.subr.bf16.mxu1 %v874_v11 }
  0xf9   : > { %v347_v28 = vpop.f32.mrb[10].mxu0 }
  0xfa   : > { %v371_v30 = vmax.f32 %v347_v28, 0.0  ;;  %v774_v31 = vpop.f32.mrb[11].mxu0 }
  0xfc   : > { %v842_v32 = vpack.c.bf16 %v371_v30, %v370_v29 }
  0xfd   : > { %v352_v33 = vpop.f32.mrb[12].mxu0 }
  0xfe   : > { %v777_v34 = vpop.f32.mrb[13].mxu0  ;;  %843 = vmatpush3.bf16.msra.mxu1 %v842_v32  ;;  %v372_v36 = vmax.f32 %v352_v33, 0.0 }
  0xff   : > { %844 = vmatprep.subr.bf16.mxu1 %v874_v11 }
 0x101   : > { %v357_v35 = vpop.f32.mrb[14].mxu0 }
 0x102   : > { %v373_v37 = vmax.f32 %v357_v35, 0.0  ;;  %v780_v38 = vpop.f32.mrb[15].mxu0 }
 0x104   : > { %v845_v39 = vpack.c.bf16 %v373_v37, %v372_v36 }
 0x105   : > { %v362_v40 = vpop.f32.mrb[16].mxu0 }
 0x106   : > { %v374_v41 = vmax.f32 %v362_v40, 0.0  ;;  %846 = vmatpush3.bf16.msra.mxu1 %v845_v39  ;;  %v783_v42 = vpop.f32.mrb[17].mxu0 }
 0x107   : > { %800 = vmatprep.subr.mxu1 %v872_v0 }
 0x10a   : > { %801 = vmatpush3.msk.msra.mxu1 %vm396_vm2, %v374_v41 }
 0x10b   : > { %803 = vmatmul.mubr.msk.f32.vlgmr.msra.gmra.mrb[0].mxu1 %vm380_vm3, %v375_v43  ;;  %830 = vmatprep.subr.mxu1 %v872_v0 }
 0x10c   : > { %805 = vmatprep.mubr.msk.f32.mxu1 %vm873_vm0, %v872_v0 }
 0x10f   : > { %806 = vmatmul.mubr.msk.f32.gmra.mrb[2].mxu1 %vm380_vm3, %v376_v44 }
 0x110   : > { %808 = vmatprep.mubr.msk.f32.mxu1 %vm873_vm0, %v872_v0 }
 0x113   : > { %809 = vmatmul.mubr.msk.f32.gmra.mrb[4].mxu1 %vm380_vm3, %v377_v45 }
 0x114   : > { %811 = vmatprep.mubr.msk.f32.mxu1 %vm873_vm0, %v872_v0 }
 0x117   : > { %812 = vmatmul.mubr.msk.f32.gmra.mrb[6].mxu1 %vm380_vm3, %v378_v46 }
 0x118   : > { %814 = vmatprep.mubr.msk.f32.mxu1 %vm873_vm0, %v872_v0 }
 0x11b   : > { %815 = vmatmul.mubr.msk.f32.gmra.mrb[8].mxu1 %vm380_vm3, %v379_v47 }
 0x11c   : > { %832 = vmatprep.mubr.msk.f32.mxu1 %vm873_vm0, %v872_v0 }
 0x1de   : > { %v466_v48 = vpop.f32.mrb[0].mxu1 }
 0x1df   : > { %v804_v49 = vpop.f32.mrb[1].mxu1  ;;  %v490_v51 = vmax.f32 %v466_v48, 0.0 }
 0x1e2   : > { %v471_v50 = vpop.f32.mrb[2].mxu1 }
 0x1e3   : > { %v491_v52 = vmax.f32 %v471_v50, 0.0  ;;  %v807_v53 = vpop.f32.mrb[3].mxu1 }
 0x1e5   : > { %v848_v54 = vpack.c.bf16 %v491_v52, %v490_v51 }
 0x1e6   : > { %v476_v55 = vpop.f32.mrb[4].mxu1 }
 0x1e7   : > { %849 = vmatpush3.bf16.msra.mxu0 %v848_v54  ;;  %v810_v56 = vpop.f32.mrb[5].mxu1  ;;  %v492_v58 = vmax.f32 %v476_v55, 0.0 }
 0x1e8   : > { %850 = vmatprep.subr.bf16.mxu0 %v874_v11 }
 0x1ea   : > { %v481_v57 = vpop.f32.mrb[6].mxu1 }
 0x1eb   : > { %v493_v59 = vmax.f32 %v481_v57, 0.0  ;;  %v813_v60 = vpop.f32.mrb[7].mxu1 }
 0x1ed   : > { %v851_v61 = vpack.c.bf16 %v493_v59, %v492_v58 }
 0x1ee   : > { %v486_v62 = vpop.f32.mrb[8].mxu1 }
 0x1ef   : > { %852 = vmatpush3.bf16.msra.mxu0 %v851_v61  ;;  %v494_v63 = vmax.f32 %v486_v62, 0.0  ;;  %v816_v1 = vpop.f32.mrb[9].mxu1 }
 0x1f0   : > { %825 = vmatprep.subr.mxu0 %v872_v0 }
 0x1f3   : > { %826 = vmatpush3.msk.msra.mxu0 %vm396_vm2, %v494_v63 }
 0x1f4   : > { %828 = vmatmul.mubr.msk.f32.vlgmr.msra.gmra.mrb[18].mxu0 %vm496_vm4, %v495_v2 }
 0x2c7   : > { %v569_v3 = vpop.f32.mrb[18].mxu0 }
 0x2c8   : > { %v573_v4 = vmax.f32 %v569_v3, 0.0  ;;  %v829_v5 = vpop.f32.mrb[19].mxu0 }
 0x2ca   : > { %831 = vmatpush3.msra.mxu1 %v573_v4 }
 0x2cb   : > { %833 = vmatmul.mubr.msk.f32.vlgmr.msra.gmra.mrb[10].mxu1 %vm228_vm1, %v574_v6 }
 0x39e   : > { %v644_v0 = vpop.f32.mrb[10].mxu1 }
 0x39f   : > { %v648_v7 = vmax.f32 %v644_v0, 0.0  ;;  %v834_v8 = vpop.f32.mrb[11].mxu1 }
 0x3a1   : > { %649 = vst [vmem:[%s217_s10] sm:$0x1] %v648_v7 }
 0x3a2 PF: > { %s15_s18 = sadd.s32 1, %s870_s18  }
 0x3a3   : > { %p12_p4 = scmp.ge.s32.totalorder %s15_s18, 4  }
 0x3a5   :  { %14 = sbr.rel (!%p12_p4) target bundleno = 1 (0x1), region = 70 }

</bundles_post_ra>
